<compile_context>
chip_gen: v6e
topology: v6e:2x2x1
jax: 0.10.0
libtpu: 0.0.40
codegen_flags: <defaults>
</compile_context>

<pallas_src>
import functools

import jax
import jax.numpy as jnp
from jax.experimental import pallas as pl
from jax.experimental.pallas import tpu as pltpu

# ~2 MiB per f32 buffer per grid step (512K elements).
_TARGET_BLOCK_ELEMS = 512 * 1024
_LANE_CANDIDATES = (4096, 2048, 1024, 512, 256, 128)


def _choose_slab(n):
    """Pick a lane width C (multiple of 128).  Prefer one that divides n so
    no padding copy is needed; otherwise fall back to C=128 + minimal pad."""
    for c in _LANE_CANDIDATES:
        if n % c == 0:
            return c, n
    c = 128
    return c, pl.cdiv(n, c) * c


# ----------------------------- kernels --------------------------------------


def _bias_sigmoid_kernel(bias_ref, x_ref, o_ref):
    y = x_ref[...].astype(jnp.float32) + bias_ref[0, 0]
    o_ref[...] = jax.nn.sigmoid(y).astype(o_ref.dtype)


def _bias_kernel(bias_ref, x_ref, o_ref):
    y = x_ref[...].astype(jnp.float32) + bias_ref[0, 0]
    o_ref[...] = y.astype(o_ref.dtype)


def _sigmoid_kernel(x_ref, o_ref):
    y = jax.nn.sigmoid(x_ref[...].astype(jnp.float32))
    o_ref[...] = y.astype(o_ref.dtype)


# ----------------------------- wrapper ---------------------------------------


@functools.partial(jax.jit, static_argnames=("task", "use_bias"))
def prediction_layer(x, bias, task="binary", use_bias=True):
    """Pallas implementation of PredictionLayer.forward.

    x    : any-shape float array (logits).
    bias : shape (1,) float array (ignored when use_bias=False).
    """
    if task not in ("binary", "multiclass", "regression"):
        raise ValueError("task must be binary,multiclass or regression")

    apply_sigmoid = task == "binary"

    # Identity path: nothing to compute, skip the HBM round trip entirely.
    if not use_bias and not apply_sigmoid:
        return x

    orig_shape = x.shape
    orig_dtype = x.dtype
    n = x.size

    lanes, n_slab = _choose_slab(n)

    x_flat = jnp.reshape(x, (-1,))
    if n_slab != n:
        # Rare path (n not a multiple of 128): pad at most 127 elements.
        x_flat = jnp.pad(x_flat, (0, n_slab - n))
    rows = n_slab // lanes
    x2d = jnp.reshape(x_flat, (rows, lanes))

    # Large row-blocks; block_rows is either a multiple of 8 or == rows, so
    # the (8,128) BlockSpec constraint always holds.  Partial trailing block
    # (when rows % block_rows != 0) is handled by Pallas.
    block_rows = min(rows, max(8, _TARGET_BLOCK_ELEMS // lanes))
    grid = (pl.cdiv(rows, block_rows),)

    spec = pl.BlockSpec((block_rows, lanes), lambda i: (i, 0))
    out_shape = jax.ShapeDtypeStruct((rows, lanes), orig_dtype)
    cparams = pltpu.CompilerParams(dimension_semantics=("parallel",))

    if use_bias:
        bias_smem = jnp.reshape(bias.astype(jnp.float32), (1, 1))
        kernel = _bias_sigmoid_kernel if apply_sigmoid else _bias_kernel
        y2d = pl.pallas_call(
            kernel,
            out_shape=out_shape,
            grid=grid,
            in_specs=[
                pl.BlockSpec(memory_space=pltpu.MemorySpace.SMEM),  # scalar bias
                spec,
            ],
            out_specs=spec,
            compiler_params=cparams,
        )(bias_smem, x2d)
    else:
        y2d = pl.pallas_call(
            _sigmoid_kernel,
            out_shape=out_shape,
            grid=grid,
            in_specs=[spec],
            out_specs=spec,
            compiler_params=cparams,
        )(x2d)

    y = jnp.reshape(y2d, (-1,))
    if n_slab != n:
        y = y[:n]
    return jnp.reshape(y, orig_shape)


if __name__ == "__main__":
    key = jax.random.PRNGKey(0)

    # Small NCHW-like logits tensor: batch=2, channels=4, spatial=16x16.
    x = jax.random.normal(key, (2, 4, 16, 16), dtype=jnp.float32)

    # Deterministic parameter init, matching nn.Parameter(torch.zeros((1,))).
    bias = jnp.zeros((1,), dtype=jnp.float32)

    # Default configuration: binary task with bias.
    out = prediction_layer(x, bias, task="binary", use_bias=True)
    out = jax.block_until_ready(out)
    ref = jax.nn.sigmoid(x + bias[0])
    assert out.shape == x.shape and out.dtype == x.dtype
    assert jnp.max(jnp.abs(out - ref)) < 1e-6

    # Regression task (bias add only, no sigmoid).
    out_reg = jax.block_until_ready(
        prediction_layer(x, bias, task="regression", use_bias=True))
    assert jnp.max(jnp.abs(out_reg - (x + bias[0]))) < 1e-6

    # Binary task without bias (sigmoid only).
    out_nb = jax.block_until_ready(
        prediction_layer(x, bias, task="binary", use_bias=False))
    assert jnp.max(jnp.abs(out_nb - jax.nn.sigmoid(x))) < 1e-6

    print("KERNEL_OK")
</pallas_src>

<mosaic_0001>
module attributes {stable_mosaic.version = 11 : i64} {
  func.func @_bias_sigmoid_kernel(%arg0: i32, %arg1: memref<1x1xf32, #tpu.memory_space<smem>>, %arg2: memref<1x2048xf32, #tpu.memory_space<vmem>>, %arg3: memref<1x2048xf32, #tpu.memory_space<vmem>>) attributes {dimension_semantics = [#tpu.dimension_semantics<parallel>], iteration_bounds = array<i64: 1>, scalar_prefetch = 0 : i64, scratch_operands = 0 : i64, tpu.core_type = #tpu.core_type<tc>, window_params = [{transform_indices = @transform_0, window_bounds = array<i64: 1, 1>}, {transform_indices = @transform_1, window_bounds = array<i64: 1, 2048>}, {transform_indices = @transform_2, window_bounds = array<i64: 1, 2048>}]} {
    %c0 = arith.constant 0 : index
    %c0_0 = arith.constant 0 : index
    %0 = vector.load %arg2[%c0, %c0_0] : memref<1x2048xf32, #tpu.memory_space<vmem>>, vector<1x2048xf32>
    %c0_1 = arith.constant 0 : index
    %c0_2 = arith.constant 0 : index
    %1 = memref.load %arg1[%c0_1, %c0_2] : memref<1x1xf32, #tpu.memory_space<smem>>
    %2 = vector.broadcast %1 : f32 to vector<1x2048xf32>
    %3 = arith.addf %0, %2 : vector<1x2048xf32>
    %4 = arith.negf %3 : vector<1x2048xf32>
    %5 = math.exp %4 : vector<1x2048xf32>
    %cst = arith.constant 1.000000e+00 : f32
    %6 = vector.broadcast %cst : f32 to vector<1x2048xf32>
    %7 = arith.addf %6, %5 : vector<1x2048xf32>
    %8 = arith.divf %6, %7 : vector<1x2048xf32>
    %c0_3 = arith.constant 0 : index
    %c0_4 = arith.constant 0 : index
    %9 = vector.load %arg3[%c0_3, %c0_4] : memref<1x2048xf32, #tpu.memory_space<vmem>>, vector<1x2048xf32>
    tpu.vector_store %arg3[%c0_3, %c0_4], %8 {strides = array<i32>} : memref<1x2048xf32, #tpu.memory_space<vmem>>, vector<1x2048xf32>,
    return
  }
  func.func @transform_0(%arg0: i32) -> (i32, i32) {
    %c0_i32 = arith.constant 0 : i32
    %c0_i32_0 = arith.constant 0 : i32
    %c0_i32_1 = arith.constant 0 : i32
    return %c0_i32, %c0_i32_0 : i32, i32
  }
  func.func @transform_1(%arg0: i32) -> (i32, i32) {
    %c0_i32 = arith.constant 0 : i32
    %c0_i32_0 = arith.constant 0 : i32
    return %arg0, %c0_i32 : i32, i32
  }
  func.func @transform_2(%arg0: i32) -> (i32, i32) {
    %c0_i32 = arith.constant 0 : i32
    %c0_i32_0 = arith.constant 0 : i32
    return %arg0, %c0_i32 : i32, i32
  }
}

</mosaic_0001>

<bundles_post_ra>
// kernel: prediction_layer.1
= control target key start
LH: loop header
LB: loop body
LE: loop exit
PB: predicated region body
PF: predicated region fallthrough
CT: control target
= control target key end

     0   :  { %s76_s0 = inlined_call_operand.<no memory space> [shape: f32[1,1], index: 0, kind: input, shape index: {}]   ;;  %s77_s1 = inlined_call_operand.vmem [shape: f32[1,2048], index: 1, kind: input, shape index: {}]   ;;  %s78_s2 = inlined_call_operand.vmem [shape: f32[1,2048], index: 2, kind: output, shape index: {}]  }
   0x1   :  { %v12_v0 = vld [vmem:[%s77_s1] sm:$0xff]  ;;  %v15_v1 = vstv %s76_s0  ;;  %v13_v2 = vld [vmem:[%s77_s1 + $0x8] sm:$0xff] }
   0x2   :  { %v16_v3 = vadd.f32 %v15_v1, %v12_v0  ;;  %v17_v4 = vadd.f32 %v15_v1, %v13_v2 }
   0x4   :  { %v36_v5 = vmul.f32 -1.442695, %v16_v3  ;;  %v37_v6 = vmul.f32 -1.442695, %v17_v4 }
   0x6   :  { %38 = vpow2.f32 %v36_v5 }
   0x7   :  { %40 = vpow2.f32 %v37_v6 }
  0x13   :  { %v39_v7 = vpop.eup %38 }
  0x14   :  { %v41_v8 = vpop.eup %40  ;;  %v24_v9 = vadd.f32 1.0, %v39_v7 }
  0x15   :  { %v25_v10 = vadd.f32 1.0, %v41_v8 }
  0x16   :  { %42 = vrcp.f32 %v24_v9 }
  0x17   :  { %44 = vrcp.f32 %v25_v10 }
  0x23   :  { %v43_v11 = vpop.eup %42 }
  0x24   :  { %v45_v12 = vpop.eup %44  ;;  %30 = vst [vmem:[%s78_s2] sm:$0xff] %v43_v11 }
  0x25   :  { %31 = vst [vmem:[%s78_s2 + $0x8] sm:$0xff] %v45_v12 }

</bundles_post_ra>
